<compile_context>
chip_gen: v6e
topology: v6e:2x2x1
jax: 0.10.0
libtpu: 0.0.40
codegen_flags: <defaults>
</compile_context>

<pallas_src>
import jax
import jax.numpy as jnp
from jax.experimental import pallas as pl
from jax.experimental.pallas import tpu as pltpu

BN_EPS = 1.0e-3          # matches the module: BatchNorm1d(..., eps=0.001)
LEAKY_SLOPE = 0.1        # LeakyReLU(negative_slope=0.1)


def linear_block_kernel(x_ref, w_ref, b_ref, gamma_ref, beta_ref, o_ref):
    # ---- Linear: bf16 x bf16 -> f32 accumulate on the MXU --------------------
    # x block is resident across grid steps; cast to bf16 here (no wrapper-side HBM pass).
    x_bf16 = x_ref[...].astype(jnp.bfloat16)
    y = jnp.dot(x_bf16, w_ref[...], preferred_element_type=jnp.float32)
    y = y + b_ref[...]                                   # f32 bias add

    # ---- LeakyReLU(0.1): mul + max instead of cmp + select + mul -------------
    y = jnp.maximum(y, LEAKY_SLOPE * y)

    # ---- BatchNorm1d (training-mode forward), fused epilogue -----------------
    # Single reduction pass: per-feature sum and sum-of-squares (biased variance).
    # Note: E[y^2]-E[y]^2 in f32 is fine for post-activation magnitudes here (eps=1e-3).
    inv_b = 1.0 / y.shape[0]
    s = jnp.sum(y, axis=0, keepdims=True)                # (1, TN)
    ss = jnp.sum(y * y, axis=0, keepdims=True)           # (1, TN)
    mean = s * inv_b
    var = ss * inv_b - mean * mean                       # biased variance
    # Fold gamma / rsqrt / beta / mean into one per-feature scale + shift.
    scale = gamma_ref[...] * jax.lax.rsqrt(var + BN_EPS)  # (1, TN)
    shift = beta_ref[...] - mean * scale                  # (1, TN)

    o_ref[...] = (y * scale + shift).astype(o_ref.dtype)


def init_linear_block_params(weight, bias, gamma, beta):
    """One-time prep: pre-transpose + cast weight to bf16, reshape vectors to (1, F_out).

    weight: (F_out, F_in) f32 (PyTorch nn.Linear layout); bias/gamma/beta: (F_out,).
    """
    f_out = weight.shape[0]
    return {
        "w_t": weight.T.astype(jnp.bfloat16),        # (F_in, F_out), bf16 MXU operand
        "b": bias.reshape(1, f_out).astype(jnp.float32),
        "gamma": gamma.reshape(1, f_out).astype(jnp.float32),
        "beta": beta.reshape(1, f_out).astype(jnp.float32),
    }


def _device_kind() -> str:
    try:
        return jax.devices()[0].device_kind.lower()
    except Exception:
        return ""


def _vmem_block_bytes(b, f_in, tn, out_bytes):
    """Conservative per-step VMEM footprint for the chosen tiling."""
    x_blk = b * f_in * 4            # f32 x, single-buffered (resident across steps)
    w_blk = 2 * f_in * tn * 2       # bf16 weight columns, double-buffered
    vec = 3 * 2 * tn * 4            # bias / gamma / beta, double-buffered
    out_blk = 2 * b * tn * out_bytes
    y_tmp = 2 * b * tn * 4          # f32 y intermediate + epilogue temps (headroom)
    return x_blk + w_blk + vec + out_blk + y_tmp


def _choose_tn(f_out, b, f_in, out_bytes, device_kind):
    is_v5 = "v5" in device_kind
    dual_core = "v7" in device_kind                  # v7x: 2 TensorCores per chip
    vmem_cap = (48 if dual_core else 96) << 20       # conservative vs 64 / 128 MiB physical
    pref_base = 128 if is_v5 else 256                # MXU N-width alignment preference

    candidates = [t for t in range(128, f_out + 1, 128) if f_out % t == 0]
    if not candidates:
        candidates = [f_out]                          # small F_out: one full-width block
    fitting = [t for t in candidates
               if _vmem_block_bytes(b, f_in, t, out_bytes) <= vmem_cap]
    candidates = fitting or [min(candidates)]
    if dual_core:                                     # keep >= 2 grid steps so both TCs work
        multi = [t for t in candidates if f_out // t >= 2]
        if multi:
            candidates = multi
    preferred = [t for t in candidates if t % pref_base == 0]
    return max(preferred) if preferred else max(candidates)


def linear_block_apply(params, x, *, tn=None, out_dtype=jnp.float32):
    """x: (B, F_in) f32. Returns (B, F_out) in out_dtype (f32 matches the nn module)."""
    B, f_in = x.shape
    f_out = params["w_t"].shape[1]
    out_bytes = jnp.dtype(out_dtype).itemsize
    device_kind = _device_kind()

    if tn is None:
        tn = _choose_tn(f_out, B, f_in, out_bytes, device_kind)
    tn = min(tn, f_out)
    assert f_out % tn == 0, "F_out must be a multiple of the column tile TN"
    grid = (f_out // tn,)

    needed = _vmem_block_bytes(B, f_in, tn, out_bytes)
    vmem_cap = (48 if "v7" in device_kind else 96) << 20
    # TODO(synk): add a batch-tiled two-pass (stats + apply) path instead of full residency.
    assert needed <= vmem_cap, (
        f"per-step VMEM footprint {needed} B exceeds budget {vmem_cap} B; tile the batch")
    vmem_limit = int(min(vmem_cap, max(needed + (8 << 20), 32 << 20)))

    return pl.pallas_call(
        linear_block_kernel,
        out_shape=jax.ShapeDtypeStruct((B, f_out), out_dtype),
        grid=grid,
        in_specs=[
            # x: constant block index -> DMA'd once, resident; single-buffer to save VMEM.
            pl.BlockSpec((B, f_in), lambda j: (0, 0), pipeline_mode=pl.Buffered(1)),
            pl.BlockSpec((f_in, tn), lambda j: (0, j)),    # W columns: double-buffered stream
            pl.BlockSpec((1, tn), lambda j: (0, j)),       # bias
            pl.BlockSpec((1, tn), lambda j: (0, j)),       # gamma
            pl.BlockSpec((1, tn), lambda j: (0, j)),       # beta
        ],
        out_specs=pl.BlockSpec((B, tn), lambda j: (0, j)),
        compiler_params=pltpu.CompilerParams(
            # BN statistics are per-feature -> column blocks are fully independent.
            dimension_semantics=("parallel",),
            vmem_limit_bytes=vmem_limit,
        ),
    )(x, params["w_t"], params["b"], params["gamma"], params["beta"])


def _reference(x, weight, bias, gamma, beta):
    """Pure-JAX reference with the same bf16 MXU-operand quantization."""
    xb = x.astype(jnp.bfloat16).astype(jnp.float32)
    wb = weight.astype(jnp.bfloat16).astype(jnp.float32)
    y = xb @ wb.T + bias
    y = jnp.where(y >= 0.0, y, LEAKY_SLOPE * y)
    mean = jnp.mean(y, axis=0, keepdims=True)
    var = jnp.mean((y - mean) ** 2, axis=0, keepdims=True)
    return (y - mean) / jnp.sqrt(var + BN_EPS) * gamma + beta


if __name__ == "__main__":
    # Small shapes consistent with LinearBlock(input_size=64, output_size=256).
    B, F_IN, F_OUT = 16, 64, 256

    key = jax.random.PRNGKey(0)
    kx, kw, kb = jax.random.split(key, 3)

    x = jax.random.normal(kx, (B, F_IN), dtype=jnp.float32)

    # Deterministic parameter init (mimicking nn.Linear's uniform fan-in scaling)
    bound = 1.0 / jnp.sqrt(jnp.float32(F_IN))
    weight = jax.random.uniform(kw, (F_OUT, F_IN), jnp.float32, -bound, bound)
    bias = jax.random.uniform(kb, (F_OUT,), jnp.float32, -bound, bound)
    gamma = jnp.ones((F_OUT,), jnp.float32)   # BatchNorm1d affine defaults
    beta = jnp.zeros((F_OUT,), jnp.float32)

    params = init_linear_block_params(weight, bias, gamma, beta)  # one-time prep

    out = linear_block_apply(params, x)       # TN auto-selected per TPU generation
    out = jax.block_until_ready(out)

    ref = _reference(x, weight, bias, gamma, beta)
    assert out.shape == (B, F_OUT)
    assert jnp.allclose(out.astype(jnp.float32), ref, atol=1e-3, rtol=1e-3), (
        float(jnp.max(jnp.abs(out.astype(jnp.float32) - ref)))
    )

    print("KERNEL_OK")
</pallas_src>

<mosaic_0001>
module attributes {stable_mosaic.version = 11 : i64} {
  func.func @linear_block_kernel(%arg0: i32, %arg1: memref<16x64xf32, #tpu.memory_space<vmem>>, %arg2: memref<64x256xbf16, #tpu.memory_space<vmem>>, %arg3: memref<1x256xf32, #tpu.memory_space<vmem>>, %arg4: memref<1x256xf32, #tpu.memory_space<vmem>>, %arg5: memref<1x256xf32, #tpu.memory_space<vmem>>, %arg6: memref<16x256xf32, #tpu.memory_space<vmem>>) attributes {dimension_semantics = [#tpu.dimension_semantics<parallel>], iteration_bounds = array<i64: 1>, scalar_prefetch = 0 : i64, scratch_operands = 0 : i64, tpu.core_type = #tpu.core_type<tc>, window_params = [{pipeline_mode = #tpu.pipeline_mode<synchronous>, transform_indices = @transform_0, window_bounds = array<i64: 16, 64>}, {transform_indices = @transform_1, window_bounds = array<i64: 64, 256>}, {transform_indices = @transform_2, window_bounds = array<i64: 1, 256>}, {transform_indices = @transform_3, window_bounds = array<i64: 1, 256>}, {transform_indices = @transform_4, window_bounds = array<i64: 1, 256>}, {transform_indices = @transform_5, window_bounds = array<i64: 16, 256>}]} {
    %c0 = arith.constant 0 : index
    %c0_0 = arith.constant 0 : index
    %0 = vector.load %arg1[%c0, %c0_0] : memref<16x64xf32, #tpu.memory_space<vmem>>, vector<16x64xf32>
    %1 = arith.truncf %0 : vector<16x64xf32> to vector<16x64xbf16>
    %c0_1 = arith.constant 0 : index
    %c0_2 = arith.constant 0 : index
    %2 = vector.load %arg2[%c0_1, %c0_2] : memref<64x256xbf16, #tpu.memory_space<vmem>>, vector<64x256xbf16>
    %cst = arith.constant dense<0.000000e+00> : vector<16x256xf32>
    %3 = tpu.matmul %1, %2, %cst {dimension_numbers = #tpu.dot_dimension_numbers<[1], [0], [0], [1], [0, 0, 1, 1], [], []>} : vector<16x64xbf16>, vector<64x256xbf16>, vector<16x256xf32> -> vector<16x256xf32>
    %c0_3 = arith.constant 0 : index
    %c0_4 = arith.constant 0 : index
    %4 = vector.load %arg3[%c0_3, %c0_4] : memref<1x256xf32, #tpu.memory_space<vmem>>, vector<1x256xf32>
    %5 = vector.broadcast %4 : vector<1x256xf32> to vector<16x256xf32>
    %6 = arith.addf %3, %5 : vector<16x256xf32>
    %cst_5 = arith.constant 1.000000e-01 : f32
    %7 = vector.broadcast %cst_5 : f32 to vector<16x256xf32>
    %8 = arith.mulf %7, %6 : vector<16x256xf32>
    %9 = arith.maximumf %6, %8 : vector<16x256xf32>
    %cst_6 = arith.constant dense<0.000000e+00> : vector<256xf32>
    %10 = vector.multi_reduction <add>, %9, %cst_6 [0] : vector<16x256xf32> to vector<256xf32>
    %11 = vector.shape_cast %10 : vector<256xf32> to vector<1x256xf32>
    %12 = arith.mulf %9, %9 : vector<16x256xf32>
    %cst_7 = arith.constant dense<0.000000e+00> : vector<256xf32>
    %13 = vector.multi_reduction <add>, %12, %cst_7 [0] : vector<16x256xf32> to vector<256xf32>
    %14 = vector.shape_cast %13 : vector<256xf32> to vector<1x256xf32>
    %cst_8 = arith.constant 6.250000e-02 : f32
    %15 = vector.broadcast %cst_8 : f32 to vector<1x256xf32>
    %16 = arith.mulf %11, %15 : vector<1x256xf32>
    %cst_9 = arith.constant 6.250000e-02 : f32
    %17 = vector.broadcast %cst_9 : f32 to vector<1x256xf32>
    %18 = arith.mulf %14, %17 : vector<1x256xf32>
    %19 = arith.mulf %16, %16 : vector<1x256xf32>
    %20 = arith.subf %18, %19 : vector<1x256xf32>
    %c0_10 = arith.constant 0 : index
    %c0_11 = arith.constant 0 : index
    %21 = vector.load %arg4[%c0_10, %c0_11] : memref<1x256xf32, #tpu.memory_space<vmem>>, vector<1x256xf32>
    %cst_12 = arith.constant 1.000000e-03 : f32
    %22 = vector.broadcast %cst_12 : f32 to vector<1x256xf32>
    %23 = arith.addf %20, %22 : vector<1x256xf32>
    %24 = math.rsqrt %23 : vector<1x256xf32>
    %25 = arith.mulf %21, %24 : vector<1x256xf32>
    %c0_13 = arith.constant 0 : index
    %c0_14 = arith.constant 0 : index
    %26 = vector.load %arg5[%c0_13, %c0_14] : memref<1x256xf32, #tpu.memory_space<vmem>>, vector<1x256xf32>
    %27 = arith.mulf %16, %25 : vector<1x256xf32>
    %28 = arith.subf %26, %27 : vector<1x256xf32>
    %29 = vector.broadcast %25 : vector<1x256xf32> to vector<16x256xf32>
    %30 = arith.mulf %9, %29 : vector<16x256xf32>
    %31 = vector.broadcast %28 : vector<1x256xf32> to vector<16x256xf32>
    %32 = arith.addf %30, %31 : vector<16x256xf32>
    %c0_15 = arith.constant 0 : index
    %c0_16 = arith.constant 0 : index
    %33 = vector.load %arg6[%c0_15, %c0_16] : memref<16x256xf32, #tpu.memory_space<vmem>>, vector<16x256xf32>
    tpu.vector_store %arg6[%c0_15, %c0_16], %32 {strides = array<i32>} : memref<16x256xf32, #tpu.memory_space<vmem>>, vector<16x256xf32>,
    return
  }
  func.func @transform_0(%arg0: i32) -> (i32, i32) {
    %c0_i32 = arith.constant 0 : i32
    %c0_i32_0 = arith.constant 0 : i32
    %c0_i32_1 = arith.constant 0 : i32
    return %c0_i32, %c0_i32_0 : i32, i32
  }
  func.func @transform_1(%arg0: i32) -> (i32, i32) {
    %c0_i32 = arith.constant 0 : i32
    %c0_i32_0 = arith.constant 0 : i32
    return %c0_i32, %arg0 : i32, i32
  }
  func.func @transform_2(%arg0: i32) -> (i32, i32) {
    %c0_i32 = arith.constant 0 : i32
    %c0_i32_0 = arith.constant 0 : i32
    return %c0_i32, %arg0 : i32, i32
  }
  func.func @transform_3(%arg0: i32) -> (i32, i32) {
    %c0_i32 = arith.constant 0 : i32
    %c0_i32_0 = arith.constant 0 : i32
    return %c0_i32, %arg0 : i32, i32
  }
  func.func @transform_4(%arg0: i32) -> (i32, i32) {
    %c0_i32 = arith.constant 0 : i32
    %c0_i32_0 = arith.constant 0 : i32
    return %c0_i32, %arg0 : i32, i32
  }
  func.func @transform_5(%arg0: i32) -> (i32, i32) {
    %c0_i32 = arith.constant 0 : i32
    %c0_i32_0 = arith.constant 0 : i32
    return %c0_i32, %arg0 : i32, i32
  }
}

</mosaic_0001>

<bundles_post_ra>
// kernel: tpu_custom_call.1
= control target key start
LH: loop header
LB: loop body
LE: loop exit
PB: predicated region body
PF: predicated region fallthrough
CT: control target
= control target key end

     0   :  { %10 = vsyncpa [#allocation3], 0  ;;  %s502_s0 = inlined_call_operand.hbm [shape: f32[16,64], index: 0, kind: input, shape index: {}]   ;;  %s503_s1 = inlined_call_operand.hbm [shape: bf16[64,256], index: 1, kind: input, shape index: {}]   ;;  %s504_s2 = inlined_call_operand.vmem [shape: f32[1,256], index: 2, kind: input, shape index: {}]   ;;  %s505_s3 = inlined_call_operand.vmem [shape: f32[1,256], index: 3, kind: input, shape index: {}]   ;;  %s506_s4 = inlined_call_operand.vmem [shape: f32[1,256], index: 4, kind: input, shape index: {}]   ;;  %s507_s5 = inlined_call_operand.hbm [shape: f32[16,256], index: 5, kind: output, shape index: {}]  }
   0x1   :  { %11 = vsyncpa [#allocation6], 0 }
   0x2   :  { %12 = vsyncpa [#allocation4], 0  ;;  %s406_s18 = smov [#allocation2]  }
   0x3   :  { %s18_s19 = sshll.u32 %s406_s18, 4  ;;  %s19_s19 = int_to_ptr.vmem [resolvable:$true] %s18_s19 }
   0x4   :  { %s348_s20 = scalar_lea.vmem %s19_s19, 256  ;;  %p353_p1 = scmp.lt.s32.totalorder %s19_s19, %s19_s19 }
   0x5   :  { %p349_p0 = scmp.ne.s32.totalorder %s19_s19, %s348_s20  ;;  %p354_p2 = scmp.lt.s32.totalorder %s348_s20, %s348_s20 }
   0x7   :  { %p355_p3 = por %p354_p2, %p353_p1 }
   0x9   :  { %p356_p4 = pnand %p355_p3, %p349_p0 }
   0xb   :  { %359 = shalt.err (!%p356_p4)
}
   0xc   :  { %s407_s21 = smov 128   ;;  %s408_s22 = smov 8  }
   0xd   :  { %24 = dma.hbm_to_vmem [thread:$0]  %s502_s0, 256, %s19_s19, [#allocation3], %s407_s21, %s407_s21, %s408_s22  }
   0xe   :  { %s409_s25 = smov [#allocation5]  }
   0xf   :  { %s30_s26 = sshll.u32 %s409_s25, 4  ;;  %s31_s26 = int_to_ptr.vmem [resolvable:$true] %s30_s26 }
  0x10   :  { %s368_s27 = scalar_lea.vmem %s31_s26, 1024  ;;  %p373_p6 = scmp.lt.s32.totalorder %s31_s26, %s31_s26 }
  0x11   :  { %p369_p5 = scmp.ne.s32.totalorder %s31_s26, %s368_s27  ;;  %p374_p7 = scmp.lt.s32.totalorder %s368_s27, %s368_s27 }
  0x13   :  { %p375_p8 = por %p374_p7, %p373_p6 }
  0x15   :  { %p376_p9 = pnand %p375_p8, %p369_p5 }
  0x17   :  { %379 = shalt.err (!%p376_p9)
}
  0x18   :  { %36 = dma.hbm_to_vmem [thread:$0]  %s503_s1, 1024, %s31_s26, [#allocation6], %s407_s21, %s407_s21, %s408_s22  }
  0x19   :  { %400 = dma.done.wait [#allocation3], 256  }
  0x1a   :  { %401 = vsyncadd [#allocation3], 4294967040 }
  0x1b   :  { %402 = dma.done.wait [#allocation6], 1024  }
  0x1c   :  { %403 = vsyncadd [#allocation6], 4294966272  ;;  %v410_v0 = vmov 0   ;;  %v324_v1 = vld [vmem:[#allocation5 + $0x34] ss:$8 sps:$4 sm:$0xff]   ;;  %vm113_vm0 = vcmask 523264   ;;  %v63_v12 = vlaneseq }
  0x1d   :  { %149 = vmatprep.mubr.bf16.mxu0 %v410_v0  ;;  %v326_v2 = vld [vmem:[#allocation5 + $0x30] ss:$8 sps:$4 sm:$0xff]   ;;  %125 = vmatprep.subr.bf16.mxu0 %v324_v1  ;;  %v327_v3 = vld [vmem:[#allocation5 + $0x24] ss:$8 sps:$4 sm:$0xff]   ;;  %v329_v4 = vld [vmem:[#allocation5 + $0x20] ss:$8 sps:$4 sm:$0xff]  }
  0x1e   :  { %126 = vmatpush1.bf16.msra.mxu0 %v326_v2  ;;  %v330_v5 = vld [vmem:[#allocation5 + $0x14] ss:$8 sps:$4 sm:$0xff]   ;;  %v332_v6 = vld [vmem:[#allocation5 + $0x10] ss:$8 sps:$4 sm:$0xff]   ;;  %v333_v7 = vld [vmem:[#allocation5 + $0x4] ss:$8 sps:$4 sm:$0xff]  }
  0x1f   :  { %127 = vmatprep.subr.bf16.mxu0 %v327_v3  ;;  %v335_v8 = vld [vmem:[#allocation5] ss:$8 sps:$4 sm:$0xff]   ;;  %v50_v9 = vld [vmem:[#allocation2] sm:$0xff]  ;;  %v51_v10 = vld [vmem:[#allocation2 + $0x8] sm:$0xff]  ;;  %v451_v13 = vshrl.u32 %v63_v12, 7 }
  0x20   :  { %v52_v11 = vpack.c.bf16 %v51_v10, %v50_v9  ;;  %v61_v15 = vld [vmem:[%s504_s2] sm:$0x3] }
  0x21   :  { %v454_v14 = vsub.s32 0, %v451_v13  ;;  %v460_v16 = vsub.s32 1, %v451_v13 }
  0x22   :  { %128 = vmatpush1.bf16.msra.mxu0 %v329_v4 }
  0x23   :  { %129 = vmatprep.subr.bf16.mxu0 %v330_v5  ;;  %v66_v17 = vrot.slane %v61_v15, %v454_v14  ;;  %v70_v18 = vrot.slane %v61_v15, %v460_v16  ;;  %v411_v15 = vmov 1966171168  }
  0x26   :  { %130 = vmatpush1.bf16.msra.mxu0 %v332_v6 }
  0x27   :  { %131 = vmatprep.subr.bf16.mxu0 %v333_v7 }
  0x2a   :  { %132 = vmatpush1.bf16.msra.mxu0 %v335_v8 }
  0x2d   :  { %314 = vmatmul.mubr.msk.bf16.vlgmr.msra.gmra.mxu0 %vm113_vm0, %v52_v11 }
  0xed   :  { %v151_v19 = vpop.f32.mrf.mxu0 }
  0xee   :  { %v152_v20 = vadd.f32 %v151_v19, %v66_v17 }
  0xef   :  { %v153_v21 = vpop.f32.mrf.mxu0 }
  0xf0   :  { %v160_v22 = vmul.f32 0.1, %v152_v20  ;;  %v154_v23 = vadd.f32 %v153_v21, %v70_v18 }
  0xf1   :  { %v155_v24 = vpop.f32.mrf.mxu0 }
  0xf2   :  { %v161_v25 = vmul.f32 0.1, %v154_v23  ;;  %v156_v26 = vadd.f32 %v155_v24, %v66_v17  ;;  %v464_v28 = vmax.f32 %v152_v20, %v160_v22  ;;  %v217_v17 = vunpack.c.l.s4 %v411_v15  ;;  %v208_v24 = vld [vmem:[%s505_s3] sm:$0x3]  ;;  %s412_s3 = smov [#allocation7]  }
  0xf3   :  { %v157_v27 = vpop.f32.mrf.mxu0  ;;  %s293_s8 = sshll.u32 %s412_s3, 4  ;;  %s294_s8 = int_to_ptr.vmem [resolvable:$true] %s293_s8 }
  0xf4   :  { %v162_v29 = vmul.f32 0.1, %v156_v26  ;;  %v158_v30 = vadd.f32 %v157_v27, %v70_v18  ;;  %v466_v31 = vmax.f32 %v154_v23, %v161_v25  ;;  %v182_v34 = vmul.f32 %v464_v28, %v464_v28  ;;  %p385_p11 = scmp.lt.s32.totalorder %s294_s8, %s294_s8 }
  0xf5   :  { %v218_v18 = vunpack.c.0.s8 %v217_v17 }
  0xf6   :  { %v468_v32 = vmax.f32 %v156_v26, %v162_v29  ;;  %v163_v33 = vmul.f32 0.1, %v158_v30  ;;  %v183_v38 = vmul.f32 %v466_v31, %v466_v31 }
  0xf7   :  { %v221_v20 = vsub.s32 %v218_v18, %v451_v13  ;;  %v232_v13 = vld [vmem:[%s506_s4] sm:$0x3]  ;;  %s380_s4 = scalar_lea.vmem %s294_s8, 512 }
  0xf8   :  { %v168_v35 = vadd.f32 %v468_v32, %v464_v28  ;;  %v184_v36 = vmul.f32 %v468_v32, %v468_v32  ;;  %v476_v37 = vmax.f32 %v158_v30, %v163_v33  ;;  %p381_p10 = scmp.ne.s32.totalorder %s294_s8, %s380_s4  ;;  %p386_p12 = scmp.lt.s32.totalorder %s380_s4, %s380_s4 }
  0xfa   :  { %v169_v39 = vrot.slane %v168_v35, 4  ;;  %v186_v40 = vadd.f32 %v184_v36, %v182_v34  ;;  %v175_v41 = vadd.f32 %v476_v37, %v466_v31  ;;  %v185_v42 = vmul.f32 %v476_v37, %v476_v37  ;;  %p387_p13 = por %p386_p12, %p385_p11 }
  0xfc   :  { %v170_v43 = vadd.f32 %v169_v39, %v168_v35  ;;  %v187_v44 = vrot.slane %v186_v40, 4  ;;  %v176_v45 = vrot.slane %v175_v41, 4  ;;  %v193_v46 = vadd.f32 %v185_v42, %v183_v38  ;;  %p388_p0 = pnand %p387_p13, %p381_p10 }
  0xfe   :  { %v171_v47 = vrot.slane %v170_v43, 2  ;;  %v188_v48 = vadd.f32 %v187_v44, %v186_v40  ;;  %v177_v49 = vadd.f32 %v176_v45, %v175_v41  ;;  %v194_v50 = vrot.slane %v193_v46, 4 }
 0x100   :  { %v172_v51 = vadd.f32 %v171_v47, %v170_v43  ;;  %v189_v52 = vrot.slane %v188_v48, 2  ;;  %v178_v53 = vrot.slane %v177_v49, 2  ;;  %v195_v54 = vadd.f32 %v194_v50, %v193_v46 }
 0x102   :  { %v173_v55 = vrot.slane %v172_v51, 1  ;;  %v190_v56 = vadd.f32 %v189_v52, %v188_v48  ;;  %v179_v57 = vadd.f32 %v178_v53, %v177_v49  ;;  %v196_v58 = vrot.slane %v195_v54, 2 }
 0x104   :  { %v174_v59 = vadd.f32 %v173_v55, %v172_v51  ;;  %v191_v60 = vrot.slane %v190_v56, 1  ;;  %v180_v61 = vrot.slane %v179_v57, 1  ;;  %v197_v62 = vadd.f32 %v196_v58, %v195_v54 }
 0x106   :  { %v192_v63 = vadd.f32 %v191_v60, %v190_v56  ;;  %v200_v0 = vmul.f32 0.0625, %v174_v59  ;;  %v181_v1 = vadd.f32 %v180_v61, %v179_v57  ;;  %v198_v2 = vrot.slane %v197_v62, 1 }
 0x108   :  { %v202_v3 = vmul.f32 0.0625, %v192_v63  ;;  %v204_v4 = vmul.f32 %v200_v0, %v200_v0  ;;  %v199_v5 = vadd.f32 %v198_v2, %v197_v62  ;;  %v201_v6 = vmul.f32 0.0625, %v181_v1 }
 0x10a   :  { %v206_v7 = vsub.f32 %v202_v3, %v204_v4  ;;  %v203_v8 = vmul.f32 0.0625, %v199_v5  ;;  %v205_v9 = vmul.f32 %v201_v6, %v201_v6 }
 0x10c   :  { %v209_v10 = vadd.f32 0.001, %v206_v7  ;;  %v207_v11 = vsub.f32 %v203_v8, %v205_v9 }
 0x10e   :  { %v210_v12 = vadd.f32 0.001, %v207_v11  ;;  %336 = vrsqrt.f32 %v209_v10 }
 0x110   :  { %338 = vrsqrt.f32 %v210_v12 }
 0x11b   :  { %v337_v19 = vpop.eup %336 }
 0x11d   :  { %v339_v21 = vpop.eup %338 }
 0x11e   :  { %v215_v22 = vcombine.low %v337_v19, %v339_v21 }
 0x120   :  { %v222_v23 = vrot.slane %v215_v22, %v221_v20 }
 0x122   :  { %v229_v25 = vrot.slane %v222_v23, %v221_v20 }
 0x124   :  { %v231_v26 = vmul.f32 %v229_v25, %v208_v24 }
 0x126   :  { %v237_v27 = vrot.slane %v231_v26, %v454_v14  ;;  %v241_v29 = vrot.slane %v231_v26, %v460_v16 }
 0x128   :  { %v244_v30 = vmul.f32 %v237_v27, %v200_v0  ;;  %v245_v33 = vmul.f32 %v241_v29, %v201_v6  ;;  %v265_v39 = vmul.f32 %v237_v27, %v464_v28  ;;  %v266_v40 = vmul.f32 %v241_v29, %v466_v31 }
 0x129   :  { %v267_v41 = vmul.f32 %v237_v27, %v468_v32  ;;  %v268_v42 = vmul.f32 %v241_v29, %v476_v37 }
 0x12a   :  { %v248_v34 = vcombine.low %v244_v30, %v245_v33 }
 0x12c   :  { %v255_v35 = vrot.slane %v248_v34, %v221_v20 }
 0x12e   :  { %v262_v36 = vrot.slane %v255_v35, %v221_v20 }
 0x130   :  { %v264_v38 = vsub.f32 %v232_v13, %v262_v36 }
 0x132   :  { %v273_v43 = vrot.slane %v264_v38, %v454_v14  ;;  %v277_v44 = vrot.slane %v264_v38, %v460_v16 }
 0x134   :  { %v280_v45 = vadd.f32 %v273_v43, %v265_v39  ;;  %v281_v46 = vadd.f32 %v277_v44, %v266_v40  ;;  %v282_v47 = vadd.f32 %v273_v43, %v267_v41  ;;  %v283_v48 = vadd.f32 %v277_v44, %v268_v42 }
 0x136   :  { %285 = vst [vmem:[#allocation7 + $0x8] sm:$0xff] %v281_v46  ;;  %287 = vst [vmem:[#allocation7 + $0x18] sm:$0xff] %v283_v48 }
 0x137   :  { %284 = vst [vmem:[#allocation7] sm:$0xff] %v280_v45  ;;  %286 = vst [vmem:[#allocation7 + $0x10] sm:$0xff] %v282_v47 }
 0x138   :  { %391 = shalt.err (!%p388_p0)
}
 0x139   :  { %s413_s9 = smov 256   ;;  %s414_s10 = smov 16  }
 0x13a   :  { %299 = dma.vmem_to_hbm [thread:$0]  %s294_s8, 512, %s507_s5, [#allocation4], %s413_s9, %s413_s9, %s414_s10  }
 0x13b   :  { %404 = dma.done.wait [#allocation4], 512  }
 0x13c   :  { %405 = vsyncadd [#allocation4], 4294966784 }
 0x13d   :  { %303 = vsyncpa [#allocation3], 1 }
 0x13e   :  { %304 = vsyncpa [#allocation6], 1 }
 0x13f   :  { %305 = vsyncpa [#allocation4], 1 }

</bundles_post_ra>
